<compile_context>
chip_gen: v5e
topology: v5e:2x2
jax: 0.10.0
libtpu: 0.0.40
codegen_flags: <defaults>
</compile_context>

<pallas_src>
import functools

import jax
import jax.numpy as jnp
from jax.experimental import pallas as pl
from jax.experimental.pallas import tpu as pltpu

X_DIM = 2
Y_DIM = 2
H_DIM = [8, 16, 8, 4]
DEFAULT_TILE_B = 8192     # batch (lane) tile; x+out double-buffers ~= 2*2*(2*8192*4B) = 256 KiB
CHUNK_B = 512             # inner lane-chunk size (keeps activations in vregs across layers)


def _round_up(n, m):
    return ((n + m - 1) // m) * m


def _mlp_kernel(x_ref,
                w00_ref, w01_ref, b0_ref,
                w1_ref, b1_ref, w2_ref, b2_ref, w3_ref, b3_ref, w4_ref, b4_ref,
                out_ref, *, return_logits: bool, chunk: int, n_chunks: int):
    """Forward pass for one batch tile. Features on sublanes, batch on lanes."""
    f32 = jnp.float32
    bf16 = jnp.bfloat16

    # Hoist weight / bias loads out of the lane-chunk loop (weights already bf16).
    w00 = w00_ref[...]            # (8, 1)  f32  layer-0 weight column 0
    w01 = w01_ref[...]            # (8, 1)  f32  layer-0 weight column 1
    b0 = b0_ref[...]              # (8, 1)  f32
    w1 = w1_ref[...]              # (16, 8) bf16
    b1 = b1_ref[...]              # (16, 1) f32
    w2 = w2_ref[...]              # (8, 16) bf16
    b2 = b2_ref[...]              # (8, 1)  f32
    w3 = w3_ref[...]              # (8, 8)  bf16 (rows 4..7 zero)
    b3 = b3_ref[...]              # (8, 1)  f32  (rows 4..7 zero)
    w4 = w4_ref[...]              # (8, 8)  bf16 (rows 2..7 and cols 4..7 zero)
    b4 = b4_ref[...]              # (2, 1)  f32

    # Fully unrolled lane-chunk loop: run all 5 layers on one `chunk`-lane slice
    # before touching the next, so the (feat, chunk) intermediates never spill to
    # VMEM scratch between layers.  Offsets are static => plain aligned slices.
    for c in range(n_chunks):
        off = c * chunk
        xc = x_ref[:, off:off + chunk]                                   # (2, chunk) f32

        # Layer 0 (2 -> 8): contraction dim is only 2 -> cheaper on the VPU.
        h = jnp.maximum(w00 * xc[0:1, :] + w01 * xc[1:2, :] + b0, 0.0)   # (8, chunk) f32
        h = h.astype(bf16)
        # Layer 1 (8 -> 16), MXU bf16, f32 accumulation.
        h = jnp.maximum(jnp.dot(w1, h, preferred_element_type=f32) + b1, 0.0).astype(bf16)
        # Layer 2 (16 -> 8).
        h = jnp.maximum(jnp.dot(w2, h, preferred_element_type=f32) + b2, 0.0).astype(bf16)
        # Layer 3 (8 -> 4, output zero-padded to 8 rows; padded rows stay relu(0)=0).
        h = jnp.maximum(jnp.dot(w3, h, preferred_element_type=f32) + b3, 0.0).astype(bf16)
        # Logits (4 -> 2); keep only the 2 valid rows before the bias add.
        lg = jnp.dot(w4, h, preferred_element_type=f32)[:Y_DIM, :] + b4  # (2, chunk) f32

        if return_logits:
            out_ref[:, off:off + chunk] = lg
        else:
            # log_softmax over the 2 valid rows only (no masking, 2 rows of EUP work).
            m = jnp.max(lg, axis=0, keepdims=True)                       # (1, chunk)
            s = jnp.sum(jnp.exp(lg - m), axis=0, keepdims=True)          # (1, chunk)
            out_ref[:, off:off + chunk] = lg - m - jnp.log(s)


def pack_params(params):
    """Pack / pad the 5 (W, b) pairs into kernel-friendly arrays.  Call ONCE."""
    def pad(a, shape, dtype):
        out = jnp.zeros(shape, dtype)
        return out.at[tuple(slice(0, s) for s in a.shape)].set(a.astype(dtype))

    W0, b0 = params["h0"]        # W stored as (in, out) = Linear weight transposed
    W1, b1 = params["h1"]
    W2, b2 = params["h2"]
    W3, b3 = params["h3"]
    W4, b4 = params["logits"]

    return (
        # Layer 0 (2 -> 8) runs on the VPU: pass its two weight columns as (8, 1) f32.
        pad(jnp.asarray(W0, jnp.float32).T[:, 0:1], (8, 1), jnp.float32),
        pad(jnp.asarray(W0, jnp.float32).T[:, 1:2], (8, 1), jnp.float32),
        pad(jnp.asarray(b0)[:, None], (8, 1), jnp.float32),
        # MXU layers: bf16 (out, in) weights, f32 biases; zero padding is exact.
        pad(jnp.asarray(W1, jnp.float32).T, (16, 8), jnp.bfloat16),
        pad(jnp.asarray(b1)[:, None], (16, 1), jnp.float32),
        pad(jnp.asarray(W2, jnp.float32).T, (8, 16), jnp.bfloat16),
        pad(jnp.asarray(b2)[:, None], (8, 1), jnp.float32),
        pad(jnp.asarray(W3, jnp.float32).T, (8, 8), jnp.bfloat16),
        pad(jnp.asarray(b3)[:, None], (8, 1), jnp.float32),
        pad(jnp.asarray(W4, jnp.float32).T, (8, 8), jnp.bfloat16),
        pad(jnp.asarray(b4)[:, None], (Y_DIM, 1), jnp.float32),
    )


@functools.partial(jax.jit, static_argnames=("logits", "tile_b"))
def simple_halfmoon_nn(x, packed_params, logits=True, tile_b=DEFAULT_TILE_B):
    """x: (B, x_dim) float32.  packed_params: output of pack_params."""
    B = x.shape[0]
    B128 = _round_up(max(B, 1), 128)

    # Lane tile: multiple of 128, capped at tile_b and at ceil(B/2) so the grid has
    # >= 2 steps whenever possible (both v7x TensorCores engage via "parallel").
    tile = min(_round_up(tile_b, 128), _round_up(pl.cdiv(B128, 2), 128))
    tile = max(tile, 128)
    n_tiles = pl.cdiv(B128, tile)
    B_pad = n_tiles * tile

    # Inner lane-chunk: largest multiple of 128 (<= CHUNK_B) that divides the tile.
    chunk = min(CHUNK_B, tile)
    while tile % chunk:
        chunk -= 128
    n_chunks = tile // chunk

    # Feature-major, lane-dense input stream: (X_DIM, B_pad), only the real 2 rows.
    xT = x.astype(jnp.float32).T
    x_p = xT if B == B_pad else jnp.zeros((X_DIM, B_pad), jnp.float32).at[:, :B].set(xT)

    kernel = functools.partial(_mlp_kernel, return_logits=logits,
                               chunk=chunk, n_chunks=n_chunks)

    resident = lambda i: (0, 0)   # constant index_map -> params stay VMEM-resident
    param_specs = [pl.BlockSpec(p.shape, resident) for p in packed_params]

    out_p = pl.pallas_call(
        kernel,
        out_shape=jax.ShapeDtypeStruct((Y_DIM, B_pad), jnp.float32),
        grid_spec=pltpu.PrefetchScalarGridSpec(
            num_scalar_prefetch=0,
            grid=(n_tiles,),
            in_specs=[pl.BlockSpec((X_DIM, tile), lambda i: (0, i))] + param_specs,
            out_specs=pl.BlockSpec((Y_DIM, tile), lambda i: (0, i)),
        ),
        compiler_params=pltpu.CompilerParams(
            dimension_semantics=("parallel",),
        ),
    )(x_p, *packed_params)

    return out_p[:, :B].T


def init_params(key):
    """Deterministic init matching nn.Linear shapes (stored as (in, out) = W^T)."""
    dims = [X_DIM, *H_DIM, Y_DIM]
    names = ("h0", "h1", "h2", "h3", "logits")
    params = {}
    for i, name in enumerate(names):
        fan_in, fan_out = dims[i], dims[i + 1]
        key, kw, kb = jax.random.split(key, 3)
        bound = 1.0 / jnp.sqrt(fan_in)
        W = jax.random.uniform(kw, (fan_in, fan_out), jnp.float32, -bound, bound)
        b = jax.random.uniform(kb, (fan_out,), jnp.float32, -bound, bound)
        params[name] = (W, b)
    return params


def _reference(x, params, logits=True):
    h = x
    for name in ("h0", "h1", "h2", "h3"):
        W, b = params[name]
        h = jnp.maximum(h @ W + b, 0.0)
    W, b = params["logits"]
    lg = h @ W + b
    return lg if logits else jax.nn.log_softmax(lg, axis=-1)


if __name__ == "__main__":
    key = jax.random.PRNGKey(0)
    kx, kx2, kx3, kp = jax.random.split(key, 4)
    params = init_params(kp)
    packed = pack_params(params)      # packed / padded / bf16-cast once, reused per call

    # Tolerance note: weights + inter-layer activations are bf16 in the kernel (per the
    # perf review); the reference is pure f32, so compare with a bf16-sized tolerance.
    TOL = dict(atol=5e-2, rtol=5e-2)

    # Small batch: single grid step, single lane chunk.
    B = 8
    x = jax.random.normal(kx, (B, X_DIM), jnp.float32)
    out_logits = jax.block_until_ready(simple_halfmoon_nn(x, packed, logits=True))
    out_logprobs = jax.block_until_ready(simple_halfmoon_nn(x, packed, logits=False))
    assert out_logits.shape == (B, Y_DIM)
    assert out_logprobs.shape == (B, Y_DIM)
    assert jnp.allclose(out_logits, _reference(x, params, True), **TOL)
    assert jnp.allclose(out_logprobs, _reference(x, params, False), **TOL)
    # log-probs over the 2 classes must normalize (independent of bf16 weights).
    assert jnp.allclose(jnp.sum(jnp.exp(out_logprobs), axis=-1), 1.0, atol=1e-4)

    # Ragged batch with a small tile -> 3 streamed grid steps with resident weights.
    B2 = 300
    x2 = jax.random.normal(kx2, (B2, X_DIM), jnp.float32)
    out2 = jax.block_until_ready(simple_halfmoon_nn(x2, packed, logits=False, tile_b=128))
    assert out2.shape == (B2, Y_DIM)
    assert jnp.allclose(out2, _reference(x2, params, False), **TOL)

    # Medium batch with the default tile -> 2 parallel grid steps, 2 lane chunks each.
    B3 = 2048
    x3 = jax.random.normal(kx3, (B3, X_DIM), jnp.float32)
    out3 = jax.block_until_ready(simple_halfmoon_nn(x3, packed, logits=True))
    assert out3.shape == (B3, Y_DIM)
    assert jnp.allclose(out3, _reference(x3, params, True), **TOL)

    print("KERNEL_OK")
</pallas_src>

<mosaic_0001>
module attributes {stable_mosaic.version = 11 : i64} {
  func.func @_mlp_kernel(%arg0: i32, %arg1: memref<2x128xf32, #tpu.memory_space<vmem>>, %arg2: memref<8x1xf32, #tpu.memory_space<vmem>>, %arg3: memref<8x1xf32, #tpu.memory_space<vmem>>, %arg4: memref<8x1xf32, #tpu.memory_space<vmem>>, %arg5: memref<16x8xbf16, #tpu.memory_space<vmem>>, %arg6: memref<16x1xf32, #tpu.memory_space<vmem>>, %arg7: memref<8x16xbf16, #tpu.memory_space<vmem>>, %arg8: memref<8x1xf32, #tpu.memory_space<vmem>>, %arg9: memref<8x8xbf16, #tpu.memory_space<vmem>>, %arg10: memref<8x1xf32, #tpu.memory_space<vmem>>, %arg11: memref<8x8xbf16, #tpu.memory_space<vmem>>, %arg12: memref<2x1xf32, #tpu.memory_space<vmem>>, %arg13: memref<2x128xf32, #tpu.memory_space<vmem>>) attributes {dimension_semantics = [#tpu.dimension_semantics<parallel>], iteration_bounds = array<i64: 1>, scalar_prefetch = 0 : i64, scratch_operands = 0 : i64, tpu.core_type = #tpu.core_type<tc>, window_params = [{transform_indices = @transform_0, window_bounds = array<i64: 2, 128>}, {pipeline_mode = #tpu.pipeline_mode<synchronous>, transform_indices = @transform_1, window_bounds = array<i64: 8, 1>}, {pipeline_mode = #tpu.pipeline_mode<synchronous>, transform_indices = @transform_2, window_bounds = array<i64: 8, 1>}, {pipeline_mode = #tpu.pipeline_mode<synchronous>, transform_indices = @transform_3, window_bounds = array<i64: 8, 1>}, {pipeline_mode = #tpu.pipeline_mode<synchronous>, transform_indices = @transform_4, window_bounds = array<i64: 16, 8>}, {pipeline_mode = #tpu.pipeline_mode<synchronous>, transform_indices = @transform_5, window_bounds = array<i64: 16, 1>}, {pipeline_mode = #tpu.pipeline_mode<synchronous>, transform_indices = @transform_6, window_bounds = array<i64: 8, 16>}, {pipeline_mode = #tpu.pipeline_mode<synchronous>, transform_indices = @transform_7, window_bounds = array<i64: 8, 1>}, {pipeline_mode = #tpu.pipeline_mode<synchronous>, transform_indices = @transform_8, window_bounds = array<i64: 8, 8>}, {pipeline_mode = #tpu.pipeline_mode<synchronous>, transform_indices = @transform_9, window_bounds = array<i64: 8, 1>}, {pipeline_mode = #tpu.pipeline_mode<synchronous>, transform_indices = @transform_10, window_bounds = array<i64: 8, 8>}, {pipeline_mode = #tpu.pipeline_mode<synchronous>, transform_indices = @transform_11, window_bounds = array<i64: 2, 1>}, {transform_indices = @transform_12, window_bounds = array<i64: 2, 128>}]} {
    %c0 = arith.constant 0 : index
    %c0_0 = arith.constant 0 : index
    %0 = vector.load %arg2[%c0, %c0_0] : memref<8x1xf32, #tpu.memory_space<vmem>>, vector<8x1xf32>
    %c0_1 = arith.constant 0 : index
    %c0_2 = arith.constant 0 : index
    %1 = vector.load %arg3[%c0_1, %c0_2] : memref<8x1xf32, #tpu.memory_space<vmem>>, vector<8x1xf32>
    %c0_3 = arith.constant 0 : index
    %c0_4 = arith.constant 0 : index
    %2 = vector.load %arg4[%c0_3, %c0_4] : memref<8x1xf32, #tpu.memory_space<vmem>>, vector<8x1xf32>
    %c0_5 = arith.constant 0 : index
    %c0_6 = arith.constant 0 : index
    %3 = vector.load %arg5[%c0_5, %c0_6] : memref<16x8xbf16, #tpu.memory_space<vmem>>, vector<16x8xbf16>
    %c0_7 = arith.constant 0 : index
    %c0_8 = arith.constant 0 : index
    %4 = vector.load %arg6[%c0_7, %c0_8] : memref<16x1xf32, #tpu.memory_space<vmem>>, vector<16x1xf32>
    %c0_9 = arith.constant 0 : index
    %c0_10 = arith.constant 0 : index
    %5 = vector.load %arg7[%c0_9, %c0_10] : memref<8x16xbf16, #tpu.memory_space<vmem>>, vector<8x16xbf16>
    %c0_11 = arith.constant 0 : index
    %c0_12 = arith.constant 0 : index
    %6 = vector.load %arg8[%c0_11, %c0_12] : memref<8x1xf32, #tpu.memory_space<vmem>>, vector<8x1xf32>
    %c0_13 = arith.constant 0 : index
    %c0_14 = arith.constant 0 : index
    %7 = vector.load %arg9[%c0_13, %c0_14] : memref<8x8xbf16, #tpu.memory_space<vmem>>, vector<8x8xbf16>
    %c0_15 = arith.constant 0 : index
    %c0_16 = arith.constant 0 : index
    %8 = vector.load %arg10[%c0_15, %c0_16] : memref<8x1xf32, #tpu.memory_space<vmem>>, vector<8x1xf32>
    %c0_17 = arith.constant 0 : index
    %c0_18 = arith.constant 0 : index
    %9 = vector.load %arg11[%c0_17, %c0_18] : memref<8x8xbf16, #tpu.memory_space<vmem>>, vector<8x8xbf16>
    %c0_19 = arith.constant 0 : index
    %c0_20 = arith.constant 0 : index
    %10 = vector.load %arg12[%c0_19, %c0_20] : memref<2x1xf32, #tpu.memory_space<vmem>>, vector<2x1xf32>
    %c0_21 = arith.constant 0 : index
    %c0_22 = arith.constant 0 : index
    %11 = vector.load %arg1[%c0_21, %c0_22] : memref<2x128xf32, #tpu.memory_space<vmem>>, vector<2x128xf32>
    %12 = vector.extract_strided_slice %11 {offsets = [0, 0], sizes = [1, 128], strides = [1, 1]} : vector<2x128xf32> to vector<1x128xf32>
    %13 = vector.broadcast %0 : vector<8x1xf32> to vector<8x128xf32>
    %14 = vector.broadcast %12 : vector<1x128xf32> to vector<8x128xf32>
    %15 = arith.mulf %13, %14 : vector<8x128xf32>
    %16 = vector.extract_strided_slice %11 {offsets = [1, 0], sizes = [1, 128], strides = [1, 1]} : vector<2x128xf32> to vector<1x128xf32>
    %17 = vector.broadcast %1 : vector<8x1xf32> to vector<8x128xf32>
    %18 = vector.broadcast %16 : vector<1x128xf32> to vector<8x128xf32>
    %19 = arith.mulf %17, %18 : vector<8x128xf32>
    %20 = arith.addf %15, %19 : vector<8x128xf32>
    %21 = vector.broadcast %2 : vector<8x1xf32> to vector<8x128xf32>
    %22 = arith.addf %20, %21 : vector<8x128xf32>
    %cst = arith.constant 0.000000e+00 : f32
    %23 = vector.broadcast %cst : f32 to vector<8x128xf32>
    %24 = arith.maximumf %22, %23 : vector<8x128xf32>
    %25 = arith.truncf %24 : vector<8x128xf32> to vector<8x128xbf16>
    %cst_23 = arith.constant dense<0.000000e+00> : vector<16x128xf32>
    %26 = tpu.matmul %3, %25, %cst_23 {dimension_numbers = #tpu.dot_dimension_numbers<[1], [0], [0], [1], [0, 0, 1, 1], [], []>} : vector<16x8xbf16>, vector<8x128xbf16>, vector<16x128xf32> -> vector<16x128xf32>
    %27 = vector.broadcast %4 : vector<16x1xf32> to vector<16x128xf32>
    %28 = arith.addf %26, %27 : vector<16x128xf32>
    %cst_24 = arith.constant 0.000000e+00 : f32
    %29 = vector.broadcast %cst_24 : f32 to vector<16x128xf32>
    %30 = arith.maximumf %28, %29 : vector<16x128xf32>
    %31 = arith.truncf %30 : vector<16x128xf32> to vector<16x128xbf16>
    %cst_25 = arith.constant dense<0.000000e+00> : vector<8x128xf32>
    %32 = tpu.matmul %5, %31, %cst_25 {dimension_numbers = #tpu.dot_dimension_numbers<[1], [0], [0], [1], [0, 0, 1, 1], [], []>} : vector<8x16xbf16>, vector<16x128xbf16>, vector<8x128xf32> -> vector<8x128xf32>
    %33 = vector.broadcast %6 : vector<8x1xf32> to vector<8x128xf32>
    %34 = arith.addf %32, %33 : vector<8x128xf32>
    %cst_26 = arith.constant 0.000000e+00 : f32
    %35 = vector.broadcast %cst_26 : f32 to vector<8x128xf32>
    %36 = arith.maximumf %34, %35 : vector<8x128xf32>
    %37 = arith.truncf %36 : vector<8x128xf32> to vector<8x128xbf16>
    %cst_27 = arith.constant dense<0.000000e+00> : vector<8x128xf32>
    %38 = tpu.matmul %7, %37, %cst_27 {dimension_numbers = #tpu.dot_dimension_numbers<[1], [0], [0], [1], [0, 0, 1, 1], [], []>} : vector<8x8xbf16>, vector<8x128xbf16>, vector<8x128xf32> -> vector<8x128xf32>
    %39 = vector.broadcast %8 : vector<8x1xf32> to vector<8x128xf32>
    %40 = arith.addf %38, %39 : vector<8x128xf32>
    %cst_28 = arith.constant 0.000000e+00 : f32
    %41 = vector.broadcast %cst_28 : f32 to vector<8x128xf32>
    %42 = arith.maximumf %40, %41 : vector<8x128xf32>
    %43 = arith.truncf %42 : vector<8x128xf32> to vector<8x128xbf16>
    %cst_29 = arith.constant dense<0.000000e+00> : vector<8x128xf32>
    %44 = tpu.matmul %9, %43, %cst_29 {dimension_numbers = #tpu.dot_dimension_numbers<[1], [0], [0], [1], [0, 0, 1, 1], [], []>} : vector<8x8xbf16>, vector<8x128xbf16>, vector<8x128xf32> -> vector<8x128xf32>
    %45 = vector.extract_strided_slice %44 {offsets = [0, 0], sizes = [2, 128], strides = [1, 1]} : vector<8x128xf32> to vector<2x128xf32>
    %46 = vector.broadcast %10 : vector<2x1xf32> to vector<2x128xf32>
    %47 = arith.addf %45, %46 : vector<2x128xf32>
    %c0_30 = arith.constant 0 : index
    %c0_31 = arith.constant 0 : index
    %48 = vector.load %arg13[%c0_30, %c0_31] : memref<2x128xf32, #tpu.memory_space<vmem>>, vector<2x128xf32>
    tpu.vector_store %arg13[%c0_30, %c0_31], %47 {strides = array<i32>} : memref<2x128xf32, #tpu.memory_space<vmem>>, vector<2x128xf32>,
    return
  }
  func.func @transform_0(%arg0: i32) -> (i32, i32) {
    %c0_i32 = arith.constant 0 : i32
    %c0_i32_0 = arith.constant 0 : i32
    return %c0_i32, %arg0 : i32, i32
  }
  func.func @transform_1(%arg0: i32) -> (i32, i32) {
    %c0_i32 = arith.constant 0 : i32
    %c0_i32_0 = arith.constant 0 : i32
    %c0_i32_1 = arith.constant 0 : i32
    return %c0_i32, %c0_i32_0 : i32, i32
  }
  func.func @transform_2(%arg0: i32) -> (i32, i32) {
    %c0_i32 = arith.constant 0 : i32
    %c0_i32_0 = arith.constant 0 : i32
    %c0_i32_1 = arith.constant 0 : i32
    return %c0_i32, %c0_i32_0 : i32, i32
  }
  func.func @transform_3(%arg0: i32) -> (i32, i32) {
    %c0_i32 = arith.constant 0 : i32
    %c0_i32_0 = arith.constant 0 : i32
    %c0_i32_1 = arith.constant 0 : i32
    return %c0_i32, %c0_i32_0 : i32, i32
  }
  func.func @transform_4(%arg0: i32) -> (i32, i32) {
    %c0_i32 = arith.constant 0 : i32
    %c0_i32_0 = arith.constant 0 : i32
    %c0_i32_1 = arith.constant 0 : i32
    return %c0_i32, %c0_i32_0 : i32, i32
  }
  func.func @transform_5(%arg0: i32) -> (i32, i32) {
    %c0_i32 = arith.constant 0 : i32
    %c0_i32_0 = arith.constant 0 : i32
    %c0_i32_1 = arith.constant 0 : i32
    return %c0_i32, %c0_i32_0 : i32, i32
  }
  func.func @transform_6(%arg0: i32) -> (i32, i32) {
    %c0_i32 = arith.constant 0 : i32
    %c0_i32_0 = arith.constant 0 : i32
    %c0_i32_1 = arith.constant 0 : i32
    return %c0_i32, %c0_i32_0 : i32, i32
  }
  func.func @transform_7(%arg0: i32) -> (i32, i32) {
    %c0_i32 = arith.constant 0 : i32
    %c0_i32_0 = arith.constant 0 : i32
    %c0_i32_1 = arith.constant 0 : i32
    return %c0_i32, %c0_i32_0 : i32, i32
  }
  func.func @transform_8(%arg0: i32) -> (i32, i32) {
    %c0_i32 = arith.constant 0 : i32
    %c0_i32_0 = arith.constant 0 : i32
    %c0_i32_1 = arith.constant 0 : i32
    return %c0_i32, %c0_i32_0 : i32, i32
  }
  func.func @transform_9(%arg0: i32) -> (i32, i32) {
    %c0_i32 = arith.constant 0 : i32
    %c0_i32_0 = arith.constant 0 : i32
    %c0_i32_1 = arith.constant 0 : i32
    return %c0_i32, %c0_i32_0 : i32, i32
  }
  func.func @transform_10(%arg0: i32) -> (i32, i32) {
    %c0_i32 = arith.constant 0 : i32
    %c0_i32_0 = arith.constant 0 : i32
    %c0_i32_1 = arith.constant 0 : i32
    return %c0_i32, %c0_i32_0 : i32, i32
  }
  func.func @transform_11(%arg0: i32) -> (i32, i32) {
    %c0_i32 = arith.constant 0 : i32
    %c0_i32_0 = arith.constant 0 : i32
    %c0_i32_1 = arith.constant 0 : i32
    return %c0_i32, %c0_i32_0 : i32, i32
  }
  func.func @transform_12(%arg0: i32) -> (i32, i32) {
    %c0_i32 = arith.constant 0 : i32
    %c0_i32_0 = arith.constant 0 : i32
    return %c0_i32, %arg0 : i32, i32
  }
}

</mosaic_0001>

<bundles_post_ra>
// kernel: simple_halfmoon_nn.1
= control target key start
LH: loop header
LB: loop body
LE: loop exit
PB: predicated region body
PF: predicated region fallthrough
CT: control target
= control target key end

     0   :  { %v212_v0 = vmov 0   ;;  %vm98_vm0 = vcmask 1043456   ;;  %vm94_vm1 = vcmask 64512   ;;  %vm124_vm2 = vcmask 130048   ;;  %s326_s3 = inlined_call_operand.vmem [shape: f32[8,1], index: 3, kind: input, shape index: {}]   ;;  %s327_s1 = inlined_call_operand.vmem [shape: f32[8,1], index: 1, kind: input, shape index: {}]   ;;  %s328_s5 = inlined_call_operand.vmem [shape: f32[16,1], index: 5, kind: input, shape index: {}]   ;;  %s329_s2 = inlined_call_operand.vmem [shape: f32[8,1], index: 2, kind: input, shape index: {}]   ;;  %s330_s11 = inlined_call_operand.vmem [shape: f32[2,1], index: 11, kind: input, shape index: {}]   ;;  %s331_s9 = inlined_call_operand.vmem [shape: f32[8,1], index: 9, kind: input, shape index: {}]   ;;  %s332_s7 = inlined_call_operand.vmem [shape: f32[8,1], index: 7, kind: input, shape index: {}]   ;;  %s333_s0 = inlined_call_operand.vmem [shape: f32[2,128], index: 0, kind: input, shape index: {}]   ;;  %s334_s4 = inlined_call_operand.vmem [shape: bf16[16,8], index: 4, kind: input, shape index: {}]   ;;  %s335_s6 = inlined_call_operand.vmem [shape: bf16[8,16], index: 6, kind: input, shape index: {}]   ;;  %s336_s8 = inlined_call_operand.vmem [shape: bf16[8,8], index: 8, kind: input, shape index: {}]   ;;  %s337_s10 = inlined_call_operand.vmem [shape: bf16[8,8], index: 10, kind: input, shape index: {}]   ;;  %s338_s12 = inlined_call_operand.vmem [shape: f32[2,128], index: 12, kind: output, shape index: {}]  }
   0x1   :  { %210 = vset.pattern.permute.xlu1 %v212_v0  ;;  %209 = vset.pattern.permute.xlu0 %v212_v0  ;;  %v44_v1 = vld [vmem:[%s326_s3] sm:$0xff]  ;;  %v48_v7 = vld [vmem:[%s328_s5 + $0x8] sm:$0xff] }
   0x2   :  { %v42_v2 = vld [vmem:[%s327_s1] sm:$0xff]  ;;  %73 = vperm.xlu1 %210, %v44_v1   ;;  %211 = vset.pattern.permute.xlu2 %v212_v0 }
   0x3   :  { %58 = vperm.xlu0 %209, %v42_v2   ;;  %v47_v3 = vld [vmem:[%s328_s5] sm:$0xff]  ;;  %86 = vperm.xlu2 %211, %v48_v7  }
   0x4   :  { %v43_v4 = vld [vmem:[%s329_s2] sm:$0xff] }
   0x5   :  { %v54_v5 = vld [vmem:[%s330_s11] sm:$0x3] }
   0x6   :  { %v52_v6 = vld [vmem:[%s331_s9] sm:$0xff] }
   0x7   :  { %v50_v8 = vld [vmem:[%s332_s7] sm:$0xff] }
   0x8   :  { %v55_v10 = vld [vmem:[%s333_s0] sm:$0x3] }
   0x9   :  { %v61_v11 = vperm.slane %v55_v10, 0  ;;  %v68_v12 = vperm.slane %v55_v10, 1  ;;  %v207_v22 = vld [vmem:[%s334_s4] sm:$0xff] }
   0xa   :  { %81 = vperm.xlu1 %210, %v47_v3   ;;  %v49_v32 = vld [vmem:[%s335_s6] sm:$0xf] }
   0xb   :  { %65 = vperm.xlu0 %209, %v43_v4   ;;  %121 = vperm.xlu2 %211, %v50_v8   ;;  %v51_v40 = vld [vmem:[%s336_s8] sm:$0xf] }
   0xc   :  { %v53_v48 = vld [vmem:[%s337_s10] sm:$0xf] }
  0x12   :  { %190 = vperm.xlu1 %210, %v54_v5  }
  0x13   :  { %145 = vperm.xlu0 %209, %v52_v6  }
  0x5d   :  { %v87_v26 = vpop.permute.xlu2 %86 }
  0x65   :  { %v122_v33 = vpop.permute.xlu2 %121 }
  0x74   :  { %v74_v17 = vpop.permute.xlu1 %73 }
  0x75   :  { %v59_v9 = vpop.permute.xlu0 %58 }
  0x76   :  { %v62_v14 = vmul.f32 %v61_v11, %v59_v9 }
  0x7c   :  { %v82_v24 = vpop.permute.xlu1 %81 }
  0x7d   :  { %v66_v13 = vpop.permute.xlu0 %65 }
  0x7e   :  { %v69_v15 = vmul.f32 %v68_v12, %v66_v13 }
  0x80   :  { %v70_v16 = vadd.f32 %v69_v15, %v62_v14 }
  0x82   :  { %v76_v18 = vadd.f32 %v74_v17, %v70_v16 }
  0x84   :  { %v77_v19 = vmax.f32 %v76_v18, 0.0  ;;  %v191_v49 = vpop.permute.xlu1 %190 }
  0x85   :  { %v146_v41 = vpop.permute.xlu0 %145 }
  0x86   :  { %v78_v20 = vpack.c.bf16 %v77_v19, %v77_v19 }
  0x88   :  { %v100_v21 = vsel %vm98_vm0, %v78_v20, 0 }
  0x89   :  { %109 = vmatpush.bf16.msra.mxu0 %v100_v21 }
  0x8c   :  { %203 = vmatmul.msk.bf16.vlgmr.msra.gmra.mxu0 %vm94_vm1, %v207_v22 }
 0x109   :  { %v111_v23 = vpop.f32.mrf.mxu0 }
 0x10a   :  { %v112_v25 = vadd.f32 %v111_v23, %v82_v24 }
 0x10c   :  { %v116_v29 = vmax.f32 %v112_v25, 0.0 }
 0x111   :  { %v113_v27 = vpop.f32.mrf.mxu0 }
 0x112   :  { %v114_v28 = vadd.f32 %v113_v27, %v87_v26 }
 0x114   :  { %v117_v30 = vmax.f32 %v114_v28, 0.0 }
 0x116   :  { %v118_v31 = vpack.c.bf16 %v117_v30, %v116_v29 }
 0x118   :  { %135 = vmatpush.bf16.msra.mxu1 %v118_v31 }
 0x11b   :  { %204 = vmatmul.msk.bf16.vlgmr.msra.gmra.mxu1 %vm124_vm2, %v49_v32 }
 0x198   :  { %v137_v34 = vpop.f32.mrf.mxu1 }
 0x199   :  { %v138_v35 = vadd.f32 %v137_v34, %v122_v33 }
 0x19b   :  { %v141_v36 = vmax.f32 %v138_v35, 0.0 }
 0x19d   :  { %v142_v37 = vpack.c.bf16 %v141_v36, %v141_v36 }
 0x19f   :  { %v152_v38 = vsel %vm98_vm0, %v142_v37, 0 }
 0x1a0   :  { %v139_v39 = vpop.f32.mrf.mxu1  ;;  %161 = vmatpush.bf16.msra.mxu2 %v152_v38 }
 0x1a3   :  { %205 = vmatmul.msk.bf16.vlgmr.msra.gmra.mxu2 %vm94_vm1, %v51_v40 }
 0x226   :  { %v163_v42 = vpop.f32.mrf.mxu2 }
 0x227   :  { %v164_v43 = vadd.f32 %v163_v42, %v146_v41 }
 0x229   :  { %v167_v44 = vmax.f32 %v164_v43, 0.0 }
 0x22b   :  { %v168_v45 = vpack.c.bf16 %v167_v44, %v167_v44 }
 0x22d   :  { %v173_v46 = vsel %vm98_vm0, %v168_v45, 0 }
 0x22e   :  { %v165_v47 = vpop.f32.mrf.mxu2  ;;  %182 = vmatpush.bf16.msra.mxu3 %v173_v46 }
 0x231   :  { %206 = vmatmul.msk.bf16.vlgmr.msra.gmra.mxu3 %vm94_vm1, %v53_v48 }
 0x2b4   :  { %v184_v50 = vpop.f32.mrf.mxu3 }
 0x2b5   :  { %v193_v51 = vadd.f32 %v191_v49, %v184_v50 }
 0x2b7   :  { %194 = vst [vmem:[%s338_s12] sm:$0x3] %v193_v51 }
 0x2bc   :  { %v186_v52 = vpop.f32.mrf.mxu3 }

</bundles_post_ra>
